<compile_context>
chip_gen: v5e
topology: v5e:2x2
jax: 0.10.0
libtpu: 0.0.40
codegen_flags: <defaults>
</compile_context>

<pallas_src>
import functools

import jax
import jax.numpy as jnp
from jax import lax
from jax.experimental import pallas as pl
from jax.experimental.pallas import tpu as pltpu


# ----------------------------------------------------------------------------
# Fused GEMM (+ bias + optional residual + optional ReLU) Pallas kernel.
# ----------------------------------------------------------------------------
def _gemm_body(x_ref, w_ref, b_ref, r_ref, o_ref, acc_ref, apply_relu):
    k = pl.program_id(2)

    @pl.when(k == 0)
    def _init():
        acc_ref[...] = jnp.zeros_like(acc_ref)

    acc_ref[...] += jnp.dot(x_ref[...], w_ref[...],
                            preferred_element_type=jnp.float32)

    @pl.when(k == pl.num_programs(2) - 1)
    def _finalize():
        out = acc_ref[...] + b_ref[...]
        if r_ref is not None:
            out = out + r_ref[...]            # bf16 residual promotes to f32
        if apply_relu:
            out = jnp.maximum(out, 0.0)
        o_ref[...] = out.astype(o_ref.dtype)


def _gemm_kernel(x_ref, w_ref, b_ref, o_ref, acc_ref, *, apply_relu):
    _gemm_body(x_ref, w_ref, b_ref, None, o_ref, acc_ref, apply_relu)


def _gemm_residual_kernel(x_ref, w_ref, b_ref, r_ref, o_ref, acc_ref, *,
                          apply_relu):
    _gemm_body(x_ref, w_ref, b_ref, r_ref, o_ref, acc_ref, apply_relu)


def _round_up(x, m):
    return (x + m - 1) // m * m


def _pick_tile(size, unit, max_tile):
    """Largest lane/sublane-friendly tile <= max_tile that divides padded size."""
    padded = _round_up(size, unit)
    if padded <= max_tile:
        return padded, padded
    for tile in range(max_tile, unit - 1, -unit):
        if padded % tile == 0:
            return tile, padded
    return unit, padded


def _pad2d(x, rows, cols):
    r, c = x.shape
    if (r, c) == (rows, cols):
        return x                               # skip no-op pads (no copy)
    return jnp.pad(x, ((0, rows - r), (0, cols - c)))


def pallas_gemm(lhs, rhs, bias, residual=None, apply_relu=False,
                out_dtype=jnp.float32):
    """out = [relu](lhs @ rhs + bias [+ residual]); bf16 MXU, f32 accumulate."""
    m, k = lhs.shape
    k2, n = rhs.shape
    assert k == k2 and bias.shape == (n,)

    tm, mp = _pick_tile(m, 16, 256)
    tn, np_ = _pick_tile(n, 128, 256)
    tk, kp = _pick_tile(k, 128, 1024)
    # v7x: when M fits in a single tile, split N into >=2 parallel grid steps
    # so both TensorCores get work.
    if mp == tm and np_ // tn < 2 and np_ >= 256:
        tn = 128

    # TODO(synk): fold the remaining M/N/K padding into the kernel with a
    # masked epilogue; conv1's K pad 147 -> 256 wastes ~43% of its MXU passes.
    lhs_p = _pad2d(lhs.astype(jnp.bfloat16), mp, kp)
    rhs_p = _pad2d(rhs.astype(jnp.bfloat16), kp, np_)
    bias_p = _pad2d(bias.astype(jnp.float32).reshape(1, n), 1, np_)

    inputs = [lhs_p, rhs_p, bias_p]
    in_specs = [
        pl.BlockSpec((tm, tk), lambda i, j, kk: (i, kk)),
        pl.BlockSpec((tk, tn), lambda i, j, kk: (kk, j)),
        pl.BlockSpec((1, tn), lambda i, j, kk: (0, j)),
    ]
    if residual is not None:
        inputs.append(_pad2d(residual, mp, np_))
        in_specs.append(pl.BlockSpec((tm, tn), lambda i, j, kk: (i, j)))
        kernel = functools.partial(_gemm_residual_kernel, apply_relu=apply_relu)
    else:
        kernel = functools.partial(_gemm_kernel, apply_relu=apply_relu)

    # TODO(synk): for tiny-M deep-stage layers, pipeline_mode=pl.Buffered(3) on
    # the lhs/rhs specs would further hide exposed K-step DMAs on v7x.
    out = pl.pallas_call(
        kernel,
        out_shape=jax.ShapeDtypeStruct((mp, np_), out_dtype),
        grid=(mp // tm, np_ // tn, kp // tk),
        in_specs=in_specs,
        out_specs=pl.BlockSpec((tm, tn), lambda i, j, kk: (i, j)),
        scratch_shapes=[pltpu.VMEM((tm, tn), jnp.float32)],
        compiler_params=pltpu.CompilerParams(
            dimension_semantics=("parallel", "parallel", "arbitrary"),
            vmem_limit_bytes=48 * 1024 * 1024),
    )(*inputs)
    if (mp, np_) != (m, n):
        out = out[:m, :n]
    return out


# ----------------------------------------------------------------------------
# MaxPool2d(kernel=3, stride=2, padding=1), NHWC, as a Pallas max over 9 taps.
# ----------------------------------------------------------------------------
def _maxpool_kernel(x_ref, o_ref):
    o_ref[...] = jnp.max(x_ref[...], axis=0)


def pallas_maxpool_3x3_s2(x):
    # x: (N, H, W, C) bf16.
    # TODO(synk): read the 9 taps in-kernel from a padded slab (or fuse into
    # the conv1 epilogue) to avoid materializing 9 shifted bf16 views.
    n, h, w, c = x.shape
    ksz, s, p = 3, 2, 1
    ho = (h + 2 * p - ksz) // s + 1
    wo = (w + 2 * p - ksz) // s + 1
    xp = jnp.pad(x, ((0, 0), (p, p), (p, p), (0, 0)),
                 constant_values=-jnp.inf)
    taps = [xp[:, di:di + s * ho:s, dj:dj + s * wo:s, :]
            for di in range(ksz) for dj in range(ksz)]
    stk = jnp.stack(taps, axis=0).reshape(ksz * ksz, -1)   # (9, n*ho*wo*c)

    total = stk.shape[1]
    lane, rows_per_block = 128, 64
    total_p = _round_up(total, lane * rows_per_block)
    if total_p != total:
        stk = jnp.pad(stk, ((0, 0), (0, total_p - total)),
                      constant_values=-jnp.inf)
    rows = total_p // lane
    stk = stk.reshape(ksz * ksz, rows, lane)

    out = pl.pallas_call(
        _maxpool_kernel,
        out_shape=jax.ShapeDtypeStruct((rows, lane), x.dtype),
        grid=(rows // rows_per_block,),
        in_specs=[pl.BlockSpec((ksz * ksz, rows_per_block, lane),
                               lambda i: (0, i, 0))],
        out_specs=pl.BlockSpec((rows_per_block, lane), lambda i: (i, 0)),
        compiler_params=pltpu.CompilerParams(
            dimension_semantics=("parallel",)),
    )(stk)
    return out.reshape(-1)[:total].reshape(n, ho, wo, c)


# ----------------------------------------------------------------------------
# Global average pool (Pallas spatial reduction), NHWC -> (N, C) f32.
# ----------------------------------------------------------------------------
def _gap_kernel(x_ref, o_ref):
    o_ref[...] = jnp.mean(x_ref[...].astype(jnp.float32), axis=1,
                          keepdims=True)


def pallas_global_avg_pool(x):
    n, h, w, c = x.shape
    x3 = x.reshape(n, h * w, c)
    out = pl.pallas_call(
        _gap_kernel,
        out_shape=jax.ShapeDtypeStruct((n, 1, c), jnp.float32),
        grid=(n,),
        in_specs=[pl.BlockSpec((1, h * w, c), lambda i: (i, 0, 0))],
        out_specs=pl.BlockSpec((1, 1, c), lambda i: (i, 0, 0)),
        compiler_params=pltpu.CompilerParams(
            dimension_semantics=("parallel",)),
    )(x3)
    return out.reshape(n, c)


# ----------------------------------------------------------------------------
# Conv (NHWC, as reshape / im2col + fused GEMM), head, ResNet-50 structure.
# ----------------------------------------------------------------------------
def _im2col_nhwc(x, kh, kw, stride, padding):
    """NHWC -> (n*ho*wo, kh*kw*c) bf16 patches; K order (tap, channel)."""
    n, h, w, c = x.shape
    if padding:
        x = jnp.pad(x, ((0, 0), (padding, padding), (padding, padding), (0, 0)))
    hp, wp = x.shape[1], x.shape[2]
    ho = (hp - kh) // stride + 1
    wo = (wp - kw) // stride + 1
    taps = [x[:, di:di + stride * ho:stride, dj:dj + stride * wo:stride, :]
            for di in range(kh) for dj in range(kw)]
    col = jnp.stack(taps, axis=3)                     # (n, ho, wo, kh*kw, c)
    return col.reshape(n * ho * wo, kh * kw * c), (ho, wo)


def _pallas_conv(x, p, stride, padding, relu, residual=None):
    """Conv2d (+folded BN bias) [+residual] [+ReLU] as one fused Pallas GEMM.

    x: (N, H, W, Cin) bf16.  p["w"]: (KH, KW, Cin, Cout) HWIO.  Output bf16.
    """
    w, b = p["w"], p["b"]
    kh, kw, cin, cout = w.shape
    n = x.shape[0]
    if kh == 1 and kw == 1:
        if stride > 1:
            x = x[:, ::stride, ::stride, :]
        ho, wo = x.shape[1], x.shape[2]
        cols = x.reshape(n * ho * wo, cin)            # zero-copy in NHWC
    else:
        cols, (ho, wo) = _im2col_nhwc(x, kh, kw, stride, padding)
    w2d = w.reshape(kh * kw * cin, cout)
    res2d = (residual.reshape(n * ho * wo, cout)
             if residual is not None else None)
    out2d = pallas_gemm(cols, w2d, b, residual=res2d, apply_relu=relu,
                        out_dtype=jnp.bfloat16)
    return out2d.reshape(n, ho, wo, cout)


def _pallas_head(x, fc):
    """Global average pool (Pallas reduction) + final fc GEMM (f32 output)."""
    pooled = pallas_global_avg_pool(x)                # (N, 2048) f32
    return pallas_gemm(pooled, fc["w"], fc["b"], apply_relu=False,
                       out_dtype=jnp.float32)


_STAGES = ((3, 64, 1), (4, 128, 2), (6, 256, 2), (3, 512, 2))
_EXPANSION = 4


def _forward(params, x, conv_fn, maxpool_fn, head_fn):
    x = conv_fn(x, params["conv1"], stride=2, padding=3, relu=True)
    x = maxpool_fn(x)
    for (_, _, first_stride), blocks in zip(_STAGES, params["stages"]):
        for b, blk in enumerate(blocks):
            stride = first_stride if b == 0 else 1
            identity = x
            out = conv_fn(x, blk["conv1"], stride=1, padding=0, relu=True)
            out = conv_fn(out, blk["conv2"], stride=stride, padding=1, relu=True)
            if "down" in blk:
                identity = conv_fn(x, blk["down"], stride=stride, padding=0,
                                   relu=False)
            x = conv_fn(out, blk["conv3"], stride=1, padding=0, relu=True,
                        residual=identity)
    return head_fn(x, params["fc"])


@jax.jit
def feature_extractor_forward(params, images):
    # images: (N, C, H, W) like PyTorch.  Single transpose to NHWC at entry;
    # the whole backbone then stays channels-last in bf16.
    x = images.transpose(0, 2, 3, 1).astype(jnp.bfloat16)
    return _forward(params, x, _pallas_conv, pallas_maxpool_3x3_s2,
                    _pallas_head)


# Pure JAX/XLA reference (independent conv/pool lowering) for validation.
def _ref_conv(x, p, stride, padding, relu, residual=None):
    out = lax.conv_general_dilated(
        x.astype(jnp.bfloat16), p["w"].astype(jnp.bfloat16),
        window_strides=(stride, stride),
        padding=((padding, padding), (padding, padding)),
        dimension_numbers=("NHWC", "HWIO", "NHWC"),
        preferred_element_type=jnp.float32,
    ) + p["b"][None, None, None, :]
    if residual is not None:
        out = out + residual.astype(jnp.float32)
    if relu:
        out = jnp.maximum(out, 0.0)
    return out.astype(jnp.bfloat16)


def _ref_maxpool(x):
    y = lax.reduce_window(x.astype(jnp.float32), -jnp.inf, lax.max,
                          (1, 3, 3, 1), (1, 2, 2, 1),
                          ((0, 0), (1, 1), (1, 1), (0, 0)))
    return y.astype(x.dtype)


def _ref_head(x, fc):
    pooled = x.astype(jnp.float32).mean(axis=(1, 2))
    return jnp.dot(pooled.astype(jnp.bfloat16), fc["w"].astype(jnp.bfloat16),
                   preferred_element_type=jnp.float32) + fc["b"][None, :]


def feature_extractor_reference(params, images):
    x = images.transpose(0, 2, 3, 1).astype(jnp.bfloat16)
    return _forward(params, x, _ref_conv, _ref_maxpool, _ref_head)


# ----------------------------------------------------------------------------
# Parameter init (random; eval-mode BatchNorm folded into conv weight/bias).
# Weights are stored HWIO (KH, KW, Cin, Cout) to match the NHWC data path.
# ----------------------------------------------------------------------------
def _fold_bn(w, gamma, beta, mean, var, eps=1e-5):
    scale = gamma / jnp.sqrt(var + eps)
    return {"w": w * scale[None, None, None, :], "b": beta - mean * scale}


def _conv_bn_init(key, c_in, c_out, ksize):
    fan_in = c_in * ksize * ksize
    w = jax.random.normal(key, (ksize, ksize, c_in, c_out), jnp.float32)
    w = w * (2.0 / fan_in) ** 0.5
    ones = jnp.ones((c_out,), jnp.float32)
    zeros = jnp.zeros((c_out,), jnp.float32)
    return _fold_bn(w, ones, zeros, zeros, ones)


def init_feature_extractor_params(key, num_features_extracted=256):
    n_conv = 1 + sum(nb for nb, _, _ in _STAGES) * 3 + len(_STAGES)
    keys = iter(jax.random.split(key, n_conv + 1))

    params = {"conv1": _conv_bn_init(next(keys), 3, 64, 7)}
    c_in = 64
    stages = []
    for n_blocks, width, _ in _STAGES:
        blocks = []
        for b in range(n_blocks):
            blk = {
                "conv1": _conv_bn_init(next(keys), c_in, width, 1),
                "conv2": _conv_bn_init(next(keys), width, width, 3),
                "conv3": _conv_bn_init(next(keys), width,
                                       width * _EXPANSION, 1),
            }
            if b == 0:
                blk["down"] = _conv_bn_init(next(keys), c_in,
                                            width * _EXPANSION, 1)
            blocks.append(blk)
            c_in = width * _EXPANSION
        stages.append(blocks)
    params["stages"] = stages

    kw_, kb_ = jax.random.split(next(keys))
    bound = (1.0 / c_in) ** 0.5
    params["fc"] = {
        "w": jax.random.uniform(kw_, (c_in, num_features_extracted),
                                jnp.float32, minval=-bound, maxval=bound),
        "b": jax.random.uniform(kb_, (num_features_extracted,), jnp.float32,
                                minval=-bound, maxval=bound),
    }
    return params


if __name__ == "__main__":
    key = jax.random.PRNGKey(0)
    k_params, k_img, k_a, k_b, k_c, k_d = jax.random.split(key, 6)

    # Unit check of the fused GEMM kernel (bias + bf16 residual + ReLU).
    a = jax.random.normal(k_a, (100, 700), jnp.float32)
    bm = jax.random.normal(k_b, (700, 200), jnp.float32)
    bias = jax.random.normal(k_c, (200,), jnp.float32)
    res = jax.random.normal(k_d, (100, 200), jnp.float32).astype(jnp.bfloat16)
    got = pallas_gemm(a, bm, bias, residual=res, apply_relu=True,
                      out_dtype=jnp.float32)
    want = jnp.maximum(
        jnp.dot(a.astype(jnp.bfloat16), bm.astype(jnp.bfloat16),
                preferred_element_type=jnp.float32)
        + bias[None, :] + res.astype(jnp.float32), 0.0)
    assert bool(jnp.allclose(got, want, atol=1e-2, rtol=1e-2)), "GEMM mismatch"

    # Full FeatureExtractor3Channel forward (ResNet-50 backbone -> 256 feats).
    batch, spatial = 2, 64   # 64 so that 5x spatial downsampling stays >= 2x2
    params = init_feature_extractor_params(k_params, num_features_extracted=256)
    images = jax.random.normal(k_img, (batch, 3, spatial, spatial), jnp.float32)

    out = jax.block_until_ready(feature_extractor_forward(params, images))
    assert out.shape == (batch, 256)
    assert bool(jnp.all(jnp.isfinite(out)))

    ref = feature_extractor_reference(params, images)
    rel_err = jnp.linalg.norm(out - ref) / (jnp.linalg.norm(ref) + 1e-12)
    assert bool(rel_err < 5e-2), f"relative error vs reference: {rel_err}"

    print("KERNEL_OK")
</pallas_src>

<mosaic_0001>
module attributes {stable_mosaic.version = 11 : i64} {
  func.func @_gemm_residual_kernel(%arg0: i32, %arg1: i32, %arg2: i32, %arg3: memref<112x768xbf16, #tpu.memory_space<vmem>>, %arg4: memref<768x128xbf16, #tpu.memory_space<vmem>>, %arg5: memref<1x128xf32, #tpu.memory_space<vmem>>, %arg6: memref<112x128xbf16, #tpu.memory_space<vmem>>, %arg7: memref<112x128xf32, #tpu.memory_space<vmem>>, %arg8: memref<112x128xf32, #tpu.memory_space<vmem>>) attributes {dimension_semantics = [#tpu.dimension_semantics<parallel>, #tpu.dimension_semantics<parallel>, #tpu.dimension_semantics<arbitrary>], iteration_bounds = array<i64: 1, 2, 1>, scalar_prefetch = 0 : i64, scratch_operands = 1 : i64, tpu.core_type = #tpu.core_type<tc>, window_params = [{transform_indices = @transform_0, window_bounds = array<i64: 112, 768>}, {transform_indices = @transform_1, window_bounds = array<i64: 768, 128>}, {transform_indices = @transform_2, window_bounds = array<i64: 1, 128>}, {transform_indices = @transform_3, window_bounds = array<i64: 112, 128>}, {transform_indices = @transform_4, window_bounds = array<i64: 112, 128>}]} {
    %c0_i32 = arith.constant 0 : i32
    %0 = arith.cmpi eq, %arg2, %c0_i32 : i32
    %1 = arith.extui %0 : i1 to i32
    %c0_i32_0 = arith.constant 0 : i32
    %2 = arith.cmpi ne, %1, %c0_i32_0 : i32
    scf.if %2 {
      %cst_10 = arith.constant 0.000000e+00 : f32
      %12 = vector.broadcast %cst_10 : f32 to vector<112x128xf32>
      %c0_11 = arith.constant 0 : index
      %c0_12 = arith.constant 0 : index
      %13 = vector.load %arg8[%c0_11, %c0_12] : memref<112x128xf32, #tpu.memory_space<vmem>>, vector<112x128xf32>
      tpu.vector_store %arg8[%c0_11, %c0_12], %12 {strides = array<i32>} : memref<112x128xf32, #tpu.memory_space<vmem>>, vector<112x128xf32>,
    } else {
    }
    %c0 = arith.constant 0 : index
    %c0_1 = arith.constant 0 : index
    %3 = vector.load %arg8[%c0, %c0_1] : memref<112x128xf32, #tpu.memory_space<vmem>>, vector<112x128xf32>
    %c0_2 = arith.constant 0 : index
    %c0_3 = arith.constant 0 : index
    %4 = vector.load %arg3[%c0_2, %c0_3] : memref<112x768xbf16, #tpu.memory_space<vmem>>, vector<112x768xbf16>
    %c0_4 = arith.constant 0 : index
    %c0_5 = arith.constant 0 : index
    %5 = vector.load %arg4[%c0_4, %c0_5] : memref<768x128xbf16, #tpu.memory_space<vmem>>, vector<768x128xbf16>
    %cst = arith.constant dense<0.000000e+00> : vector<112x128xf32>
    %6 = tpu.matmul %4, %5, %cst {dimension_numbers = #tpu.dot_dimension_numbers<[1], [0], [0], [1], [0, 0, 1, 1], [], []>} : vector<112x768xbf16>, vector<768x128xbf16>, vector<112x128xf32> -> vector<112x128xf32>
    %7 = arith.addf %3, %6 : vector<112x128xf32>
    %c0_6 = arith.constant 0 : index
    %c0_7 = arith.constant 0 : index
    %8 = vector.load %arg8[%c0_6, %c0_7] : memref<112x128xf32, #tpu.memory_space<vmem>>, vector<112x128xf32>
    tpu.vector_store %arg8[%c0_6, %c0_7], %7 {strides = array<i32>} : memref<112x128xf32, #tpu.memory_space<vmem>>, vector<112x128xf32>,
    %c0_i32_8 = arith.constant 0 : i32
    %9 = arith.cmpi eq, %arg2, %c0_i32_8 : i32
    %10 = arith.extui %9 : i1 to i32
    %c0_i32_9 = arith.constant 0 : i32
    %11 = arith.cmpi ne, %10, %c0_i32_9 : i32
    scf.if %11 {
      %c0_10 = arith.constant 0 : index
      %c0_11 = arith.constant 0 : index
      %12 = vector.load %arg8[%c0_10, %c0_11] : memref<112x128xf32, #tpu.memory_space<vmem>>, vector<112x128xf32>
      %c0_12 = arith.constant 0 : index
      %c0_13 = arith.constant 0 : index
      %13 = vector.load %arg5[%c0_12, %c0_13] : memref<1x128xf32, #tpu.memory_space<vmem>>, vector<1x128xf32>
      %14 = vector.broadcast %13 : vector<1x128xf32> to vector<112x128xf32>
      %15 = arith.addf %12, %14 : vector<112x128xf32>
      %c0_14 = arith.constant 0 : index
      %c0_15 = arith.constant 0 : index
      %16 = vector.load %arg6[%c0_14, %c0_15] : memref<112x128xbf16, #tpu.memory_space<vmem>>, vector<112x128xbf16>
      %17 = arith.extf %16 : vector<112x128xbf16> to vector<112x128xf32>
      %18 = arith.addf %15, %17 : vector<112x128xf32>
      %cst_16 = arith.constant 0.000000e+00 : f32
      %19 = vector.broadcast %cst_16 : f32 to vector<112x128xf32>
      %20 = arith.maximumf %18, %19 : vector<112x128xf32>
      %c0_17 = arith.constant 0 : index
      %c0_18 = arith.constant 0 : index
      %21 = vector.load %arg7[%c0_17, %c0_18] : memref<112x128xf32, #tpu.memory_space<vmem>>, vector<112x128xf32>
      tpu.vector_store %arg7[%c0_17, %c0_18], %20 {strides = array<i32>} : memref<112x128xf32, #tpu.memory_space<vmem>>, vector<112x128xf32>,
    } else {
    }
    return
  }
  func.func @transform_0(%arg0: i32, %arg1: i32, %arg2: i32) -> (i32, i32) {
    %c0_i32 = arith.constant 0 : i32
    return %arg0, %arg2 : i32, i32
  }
  func.func @transform_1(%arg0: i32, %arg1: i32, %arg2: i32) -> (i32, i32) {
    %c0_i32 = arith.constant 0 : i32
    return %arg2, %arg1 : i32, i32
  }
  func.func @transform_2(%arg0: i32, %arg1: i32, %arg2: i32) -> (i32, i32) {
    %c0_i32 = arith.constant 0 : i32
    %c0_i32_0 = arith.constant 0 : i32
    return %c0_i32, %arg1 : i32, i32
  }
  func.func @transform_3(%arg0: i32, %arg1: i32, %arg2: i32) -> (i32, i32) {
    %c0_i32 = arith.constant 0 : i32
    return %arg0, %arg1 : i32, i32
  }
  func.func @transform_4(%arg0: i32, %arg1: i32, %arg2: i32) -> (i32, i32) {
    %c0_i32 = arith.constant 0 : i32
    return %arg0, %arg1 : i32, i32
  }
}

</mosaic_0001>

<bundles_post_ra>
// kernel: tpu_custom_call.1
= control target key start
LH: loop header
LB: loop body
LE: loop exit
PB: predicated region body
PF: predicated region fallthrough
CT: control target
= control target key end

     0   :  { %s2774_s0 = inlined_call_operand.hbm [shape: bf16[112,768], index: 0, kind: input, shape index: {}]   ;;  %s2775_s1 = inlined_call_operand.hbm [shape: bf16[768,256], index: 1, kind: input, shape index: {}]   ;;  %s2776_s2 = inlined_call_operand.hbm [shape: f32[1,256], index: 2, kind: input, shape index: {}]   ;;  %s2777_s3 = inlined_call_operand.hbm [shape: bf16[112,256], index: 3, kind: input, shape index: {}]   ;;  %s2778_s4 = inlined_call_operand.hbm [shape: f32[112,256], index: 4, kind: output, shape index: {}]  }
   0x1   :  { %2788 = sst [smem:[#allocation21_spill]] %s2774_s0 }
   0x2   :  { %2789 = sst [smem:[#allocation22_spill]] %s2775_s1 }
   0x3   :  { %2790 = sst [smem:[#allocation23_spill]] %s2776_s2 }
   0x4   :  { %9 = vsyncpa [#allocation4], 0 }
   0x5   :  { %10 = vsyncpa [#allocation7], 0 }
   0x6   :  { %12 = vsyncpa [#allocation7 + $0x1], 0 }
   0x7   :  { %13 = vsyncpa [#allocation10], 0 }
   0x8   :  { %15 = vsyncpa [#allocation10 + $0x1], 0 }
   0x9   :  { %16 = vsyncpa [#allocation5], 0 }
   0xa   :  { %18 = vsyncpa [#allocation5 + $0x1], 0  ;;  %s2440_s15 = smov 0   ;;  %s2442_s16 = smov 0  }
   0xb   :  { %s2444_s17 = smov 0   ;;  %s2446_s18 = smov 0  }
   0xc   :  { %s2448_s19 = smov 0   ;;  %s2450_s20 = smov 0  }
   0xd LB: > { %2791 = sst [smem:[#allocation16_spill]] %s2392_s17  ;;  %s39_s21 = sadd.s32 1, %s2400_s19  ;;  %s2404_s20 = sphi %s2450_s20, %s24_s20   ;;  %s2400_s19 = sphi %s2448_s19, %s2816_s19   ;;  %s2396_s18 = sphi %s2446_s18, %s2815_s18   ;;  %s2392_s17 = sphi %s2444_s17, %s2811_s17   ;;  %s2388_s16 = sphi %s2442_s16, %s2814_s16   ;;  %s2384_s15 = sphi %s2440_s15, %s2813_s15  }
   0xe   : > { %2792 = sst [smem:[#allocation17_spill]] %s2404_s20  ;;  %s80_s22 = sadd.s32 1, %s2392_s17 }
   0xf   : > { %p41_p0 = scmp.ge.s32.totalorder %s39_s21, 2  ;;  %p87_p1 = scmp.ne.s32.totalorder %s2392_s17, %s2388_s16 }
  0x10   : > { %p88_p2 = scmp.eq.s32.totalorder %s2404_s20, 0  ;;  %p1589_p3 = scmp.ge.s32.totalorder %s2404_s20, 2 }
  0x11   : > { %s2818_s21 = smov (%p41_p0, %s39_s21), 0  ;;  %p2133_p5 = scmp.lt.s32.totalorder %s2404_s20, 2 }
  0x12   : > { %2793 = sst [smem:[#allocation18_spill]] %s2818_s21  ;;  %p89_p4 = por %p88_p2, %p87_p1 }
  0x13   : > { %s76_s23 = ssub.s32 %s2400_s19, %s2818_s21  ;;  %s219_s24 = sand.u32 1, %s2404_s20  }
  0x14   : > { %p78_p6 = scmp.eq.s32.totalorder %s76_s23, 0  ;;  %s2486_s25 = sand.u32 1, %s2392_s17  }
  0x15   : > { %s2782_s26 = sshll.u32 %s2400_s19, 2  ;;  %s2097_s28 = smul.u32 384, %s2486_s25 }
  0x16   : > { %s2490_s27 = scalar_select %p78_p6, %s2392_s17, %s80_s22  }
  0x17   : > { %s2795_s1 = sld [smem:[#allocation22_spill]]  ;;  %p2498_p7 = pnand %p2133_p5, %p89_p4 }
  0x18   : > { %2794 = sst [smem:[#allocation19_spill]] %s2490_s27  ;;  %s223_s8 = scalar_lea.vmem [#allocation6], %s2097_s28 }
  0x19   : > { %s233_s9 = sshll.u32 %s223_s8, 4  ;;  %s2502_s10 = scalar_lea.sflag [#allocation7], %s219_s24  ;;  %s234_s9 = int_to_ptr.vmem [resolvable:$true] %s233_s9 }
  0x1a   : > { %s2779_s11 = smov 128   ;;  %s2780_s12 = smov 64  }
  0x1b   : > { %s2781_s13 = smov 4   ;;  %s2511_s14 = sadd.s32 4294967295, %s2404_s20  }
  0x1c   : > { %s1586_s22 = sadd.s32 4294967294, %s2404_s20   ;;  %p93_p8 = scmp.ne.s32.totalorder %s2388_s16, %s2384_s15 }
  0x1d   : > { %s230_s5 = scalar_lea.hbm %s2795_s1, %s2782_s26  ;;  %p94_p9 = scmp.eq.s32.totalorder %s2511_s14, 0 }
  0x1e   : > { %s231_s6 = sshll.u32 %s230_s5, 4  ;;  %p173_p10 = scmp.eq.s32.totalorder %s2511_s14, 1  ;;  %s232_s6 = int_to_ptr.hbm [resolvable:$true] %s231_s6 }
  0x1f   : > { %2121 = dma.hbm_to_vmem [thread:$0]  (!%p2498_p7), %s232_s6, 6144, %s234_s9, %s2502_s10, %s2779_s11, %s2780_s12, %s2781_s13  }
  0x20   : > { %p179_p11 = scmp.eq.s32.totalorder %s1586_s22, 1  ;;  %p2520_p12 = por %p94_p9, %p93_p8 }
  0x21   : > { %p1587_p13 = scmp.ge.s32.totalorder %s2404_s20, 1  ;;  %p2528_p0 = por %p173_p10, %p87_p1 }
  0x22   : > { %p2532_p2 = por %p179_p11, %p93_p8  ;;  %p186_p4 = scmp.lt.s32.totalorder %s2404_s20, 3 }
  0x23   : > { %s2801_s0 = sld [smem:[#allocation21_spill]]  ;;  %s2409_s8 = smov [#allocation3]  }
  0x24   : > { %s2799_s28 = scalar_select %p2532_p2, 1, 0 }
  0x25   : > { %p2540_p5 = pnand %p1587_p13, %p186_p4  ;;  %s205_s9 = sshll.u32 %s2409_s8, 4  ;;  %s206_s9 = int_to_ptr.vmem [resolvable:$true] %s205_s9 }
  0x26   : > { %2800 = sst [smem:[#allocation20_spill]] %s2799_s28  ;;  %s246_s12 = scalar_lea.vmem [#allocation8], %s2486_s25 }
  0x27   : > { %p2114_p1 = pneg %p2540_p5  ;;  %s2803_s2 = sld [smem:[#allocation23_spill]] }
  0x28   : > { %s253_s13 = sshll.u32 %s246_s12, 4  ;;  %s2410_s26 = smov 384   ;;  %s254_s13 = int_to_ptr.vmem [resolvable:$true] %s253_s13 }
  0x29   : > { %s203_s5 = sshll.u32 %s2801_s0, 4  ;;  %p2115_p6 = pnand %p2114_p1, %p94_p9  ;;  %s204_s5 = int_to_ptr.hbm [resolvable:$true] %s203_s5 }
  0x2a   : > { %s2411_s0 = smov 24   ;;  %s2098_s8 = smul.u32 56, %s2486_s25 }
  0x2b   : > { %2117 = dma.hbm_to_vmem [thread:$0]  (!%p2115_p6), %s204_s5, 5376, %s206_s9, [#allocation4], %s2410_s26, %s2410_s26, %s2411_s0  }
  0x2c   : > { %s2804_s1 = sshll.u32 %s2400_s19, 2  ;;  %s264_s29 = scalar_lea.vmem [#allocation9], %s2098_s8 }
  0x2d   : > { %s249_s30 = scalar_lea.hbm %s2803_s2, %s2400_s19  ;;  %s271_s17 = scalar_lea.hbm %s2777_s3, %s2804_s1 }
  0x2e   : > { %s251_s11 = sshll.u32 %s249_s30, 4  ;;  %s272_s22 = sshll.u32 %s271_s17, 4  ;;  %s252_s11 = int_to_ptr.hbm [resolvable:$true] %s251_s11  ;;  %s273_s22 = int_to_ptr.hbm [resolvable:$true] %s272_s22 }
  0x2f   : > { %2124 = dma.hbm_to_vmem [thread:$0]  (!%p2498_p7), %s252_s11, 16, %s254_s13, %s2502_s10  }
  0x30   : > { %s274_s30 = sshll.u32 %s264_s29, 4  ;;  %s261_s2 = scalar_lea.sflag [#allocation10], %s2486_s25  ;;  %s275_s30 = int_to_ptr.vmem [resolvable:$true] %s274_s30 }
  0x31   : > { %s2805_s12 = smov 4   ;;  %s2806_s20 = smov 64  }
  0x32   : > { %s2807_s28 = smov 128   ;;  %286 = sbr.rel (%p2540_p5) target bundleno = 406 (0x196), region = 36 }
  0x33   : > { %2127 = dma.hbm_to_vmem [thread:$0]  (!%p2498_p7), %s273_s22, 896, %s275_s30, %s261_s2, %s2807_s28, %s2806_s20, %s2805_s12  }
  0x37   : > { %2367 = dma.done.wait (%p94_p9), [#allocation4], 5376  }
  0x38   : > { %2369 = vsyncadd (%p94_p9), [#allocation4], 4294961920  ;;  %s293_s0 = sand.u32 1, %s2511_s14   ;;  %s2576_s1 = sand.u32 1, %s2388_s16  }
  0x39   : > { %s2099_s17 = smul.u32 384, %s2576_s1  ;;  %s294_s21 = scalar_lea.sflag [#allocation7], %s293_s0 }
  0x3b   : > { %s2579_s25 = scalar_lea.vmem [#allocation6], %s2099_s17 }
  0x3c   : > { %2371 = dma.done.wait (%p2520_p12), %s294_s21, 6160  }
  0x3d   : > { %2373 = vsyncadd (%p2520_p12), %s294_s21, 4294961136  ;;  %s2100_s2 = smul.u32 56, %s2576_s1  ;;  %s306_s20 = scalar_lea.vmem [#allocation8], %s2576_s1 }
  0x3e   : > { %s313_s26 = scalar_lea.sflag [#allocation10], %s2576_s1 }
  0x3f   : > { %s2588_s27 = scalar_lea.vmem [#allocation9], %s2100_s2 }
  0x40   : > { %2375 = dma.done.wait (%p2520_p12), %s313_s26, 896  }
  0x41   : > { %2377 = vsyncadd (%p2520_p12), %s313_s26, 4294966400  ;;  %v2006_v0 = vld [vmem:[%s2579_s25 + $0x38] sm:$0xff]  ;;  %v2005_v2 = vld [vmem:[%s2579_s25 + $0x30] sm:$0xff]  ;;  %s2101_s7 = smul.u32 112, %s2576_s1  ;;  %s1954_s11 = sshll.u32 %s2396_s18, 3 }
  0x42   : > { %v2014_v1 = vld [vmem:[%s2579_s25 + $0x78] sm:$0xff]  ;;  %1024 = vmatpush.bf16.msra.mxu0 %v2006_v0  ;;  %2081 = vmatpush.bf16.msra.mxu2 %v2006_v0  ;;  %v2013_v3 = vld [vmem:[%s2579_s25 + $0x70] sm:$0xff]  ;;  %v2004_v4 = vld [vmem:[%s2579_s25 + $0x28] sm:$0xff]  ;;  %s1435_s23 = scalar_lea.hbm %s2778_s4, %s1954_s11  ;;  %s1422_s18 = scalar_lea.sflag [#allocation5], %s2576_s1 }
  0x43   : > { %1068 = vmatpush.bf16.msra.mxu1 %v2014_v1  ;;  %2089 = vmatpush.bf16.msra.mxu3 %v2014_v1  ;;  %v2012_v5 = vld [vmem:[%s2579_s25 + $0x68] sm:$0xff]  ;;  %v2003_v6 = vld [vmem:[%s2579_s25 + $0x20] sm:$0xff]  ;;  %v2002_v8 = vld [vmem:[%s2579_s25 + $0x18] sm:$0xff]  ;;  %s2684_s10 = scalar_lea.vmem [#allocation11], %s2101_s7  ;;  %s1438_s5 = sshll.u32 %s1435_s23, 4  ;;  %s1439_s5 = int_to_ptr.hbm [resolvable:$true] %s1438_s5 }
  0x44   : > { %v2011_v7 = vld [vmem:[%s2579_s25 + $0x60] sm:$0xff]  ;;  %v2010_v9 = vld [vmem:[%s2579_s25 + $0x58] sm:$0xff]  ;;  %v2001_v10 = vld [vmem:[%s2579_s25 + $0x10] sm:$0xff]  ;;  %s1436_s28 = sshll.u32 %s2684_s10, 4  ;;  %s2328_s6 = sshra.s32 %s1439_s5, 4  ;;  %s1437_s28 = int_to_ptr.vmem [resolvable:$true] %s1436_s28  ;;  %s2329_s6 = int_to_ptr.hbm [resolvable:$true] %s2328_s6 }
  0x45   : > { %v2009_v11 = vld [vmem:[%s2579_s25 + $0x50] sm:$0xff]  ;;  %v2000_v12 = vld [vmem:[%s2579_s25 + $0x8] sm:$0xff]  ;;  %v1999_v14 = vld [vmem:[%s2579_s25] sm:$0xff]  ;;  %s2330_s9 = scalar_lea.hbm %s2329_s6, 112  ;;  %s2334_s29 = scalar_lea.hbm %s2778_s4, 224 }
  0x46   : > { %1025 = vmatpush.bf16.msra.mxu0 %v2005_v2  ;;  %2082 = vmatpush.bf16.msra.mxu2 %v2005_v2  ;;  %v2008_v13 = vld [vmem:[%s2579_s25 + $0x48] sm:$0xff]  ;;  %v2007_v15 = vld [vmem:[%s2579_s25 + $0x40] sm:$0xff]  ;;  %v1596_v16 = vld [vmem:[#allocation3] sm:$0xf]  ;;  %p2331_p7 = scmp.ne.s32.totalorder %s2329_s6, %s2330_s9  ;;  %p2335_p10 = scmp.lt.s32.totalorder %s2329_s6, %s2778_s4 }
  0x47   : > { %1069 = vmatpush.bf16.msra.mxu1 %v2013_v3  ;;  %2090 = vmatpush.bf16.msra.mxu3 %v2013_v3  ;;  %v1960_v17 = vld [vmem:[#allocation3 + $0x14] sm:$0xf0]  ;;  %v1692_v18 = vld [vmem:[#allocation3 + $0xc0] sm:$0xf]  ;;  %v1957_v20 = vld [vmem:[#allocation3 + $0x4] sm:$0xf]  ;;  %p2336_p11 = scmp.lt.s32.totalorder %s2334_s29, %s2330_s9 }
  0x48   : > { %v1984_v19 = vld [vmem:[#allocation3 + $0xd4] sm:$0xf0]  ;;  %v1598_v21 = vld [vmem:[#allocation3 + $0x18] sm:$0xf0]  ;;  %v1981_v22 = vld [vmem:[#allocation3 + $0xc4] sm:$0xf]  ;;  %v1597_v26 = vor.u32 %v1960_v17, %v1596_v16  ;;  %p2332_p8 = pnand %p2331_p7, %p2528_p0 }
  0x49   : > { %v1694_v23 = vld [vmem:[#allocation3 + $0xd8] sm:$0xf0]  ;;  %v2038_v24 = vld [vmem:[%s2579_s25 + $0x138] sm:$0xff]  ;;  %v1693_v27 = vor.u32 %v1984_v19, %v1692_v18  ;;  %v1601_v28 = vor.u32 %v1957_v20, %v1598_v21  ;;  %v2037_v32 = vld [vmem:[%s2579_s25 + $0x130] sm:$0xff]  ;;  %p2337_p12 = por %p2336_p11, %p2335_p10 }
  0x4a   : > { %1026 = vmatpush.bf16.msra.mxu0 %v2004_v4  ;;  %2083 = vmatpush.bf16.msra.mxu2 %v2004_v4  ;;  %v2046_v25 = vld [vmem:[%s2579_s25 + $0x178] sm:$0xff]  ;;  %v1697_v29 = vor.u32 %v1981_v22, %v1694_v23  ;;  %v2045_v33 = vld [vmem:[%s2579_s25 + $0x170] sm:$0xff]  ;;  %v2036_v36 = vld [vmem:[%s2579_s25 + $0x128] sm:$0xff]  ;;  %p2333_p9 = pneg %p2332_p8 }
  0x4b   : > { %1070 = vmatpush.bf16.msra.mxu1 %v2012_v5  ;;  %2091 = vmatpush.bf16.msra.mxu3 %v2012_v5  ;;  %v2022_v30 = vld [vmem:[%s2579_s25 + $0xb8] sm:$0xff]  ;;  %v2021_v34 = vld [vmem:[%s2579_s25 + $0xb0] sm:$0xff]  ;;  %v2044_v37 = vld [vmem:[%s2579_s25 + $0x168] sm:$0xff] }
  0x4c   : > { %v2030_v31 = vld [vmem:[%s2579_s25 + $0xf8] sm:$0xff]  ;;  %v2029_v35 = vld [vmem:[%s2579_s25 + $0xf0] sm:$0xff]  ;;  %v2020_v38 = vld [vmem:[%s2579_s25 + $0xa8] sm:$0xff]  ;;  %p2338_p13 = pnand %p2337_p12, %p2333_p9 }
  0x4d   : > { %v2028_v39 = vld [vmem:[%s2579_s25 + $0xe8] sm:$0xff]  ;;  %v1620_v40 = vld [vmem:[#allocation3 + $0x30] sm:$0xf]  ;;  %v1966_v43 = vld [vmem:[#allocation3 + $0x44] sm:$0xf0] }
  0x4e   : > { %1027 = vmatpush.bf16.msra.mxu0 %v2003_v6  ;;  %2084 = vmatpush.bf16.msra.mxu2 %v2003_v6  ;;  %v2035_v41 = vld [vmem:[%s2579_s25 + $0x120] sm:$0xff]  ;;  %v1990_v45 = vld [vmem:[#allocation3 + $0x104] sm:$0xf0]  ;;  %v1622_v47 = vld [vmem:[#allocation3 + $0x48] sm:$0xf0]  ;;  %v1621_v54 = vor.u32 %v1966_v43, %v1620_v40 }
  0x4f   : > { %1071 = vmatpush.bf16.msra.mxu1 %v2011_v7  ;;  %2092 = vmatpush.bf16.msra.mxu3 %v2011_v7  ;;  %v2043_v42 = vld [vmem:[%s2579_s25 + $0x160] sm:$0xff]  ;;  %v1718_v49 = vld [vmem:[#allocation3 + $0x108] sm:$0xf0]  ;;  %v2033_v60 = vld [vmem:[%s2579_s25 + $0x110] sm:$0xff] }
  0x50   : > { %v1716_v44 = vld [vmem:[#allocation3 + $0xf0] sm:$0xf]  ;;  %v1963_v46 = vld [vmem:[#allocation3 + $0x34] sm:$0xf]  ;;  %v2034_v52 = vld [vmem:[%s2579_s25 + $0x118] sm:$0xff] }
  0x51   : > { %v1987_v48 = vld [vmem:[#allocation3 + $0xf4] sm:$0xf]  ;;  %v2042_v53 = vld [vmem:[%s2579_s25 + $0x158] sm:$0xff]  ;;  %v1717_v55 = vor.u32 %v1990_v45, %v1716_v44  ;;  %v1625_v56 = vor.u32 %v1963_v46, %v1622_v47  ;;  %v2041_v61 = vld [vmem:[%s2579_s25 + $0x150] sm:$0xff] }
  0x52   : > { %1028 = vmatpush.bf16.msra.mxu0 %v2002_v8  ;;  %2085 = vmatpush.bf16.msra.mxu2 %v2002_v8  ;;  %v2019_v50 = vld [vmem:[%s2579_s25 + $0xa0] sm:$0xff]  ;;  %v1721_v57 = vor.u32 %v1987_v48, %v1718_v49  ;;  %v2018_v58 = vld [vmem:[%s2579_s25 + $0x98] sm:$0xff]  ;;  %v2017_v62 = vld [vmem:[%s2579_s25 + $0x90] sm:$0xff] }
  0x53   : > { %1072 = vmatpush.bf16.msra.mxu1 %v2010_v9  ;;  %2093 = vmatpush.bf16.msra.mxu3 %v2010_v9  ;;  %v2027_v51 = vld [vmem:[%s2579_s25 + $0xe0] sm:$0xff]  ;;  %v2026_v59 = vld [vmem:[%s2579_s25 + $0xd8] sm:$0xff]  ;;  %v2025_v63 = vld [vmem:[%s2579_s25 + $0xd0] sm:$0xff] }
  0x54   : > { %v2032_v0 = vld [vmem:[%s2579_s25 + $0x108] sm:$0xff]  ;;  %v1644_v4 = vld [vmem:[#allocation3 + $0x60] sm:$0xf]  ;;  %v2031_v5 = vld [vmem:[%s2579_s25 + $0x100] sm:$0xff] }
  0x55   : > { %v2040_v1 = vld [vmem:[%s2579_s25 + $0x148] sm:$0xff]  ;;  %v2039_v6 = vld [vmem:[%s2579_s25 + $0x140] sm:$0xff]  ;;  %v1740_v8 = vld [vmem:[#allocation3 + $0x120] sm:$0xf] }
  0x56   : > { %1029 = vmatpush.bf16.msra.mxu0 %v2001_v10  ;;  %2086 = vmatpush.bf16.msra.mxu2 %v2001_v10  ;;  %v2016_v2 = vld [vmem:[%s2579_s25 + $0x88] sm:$0xff]  ;;  %v1969_v10 = vld [vmem:[#allocation3 + $0x64] sm:$0xf]  ;;  %v1668_v20 = vld [vmem:[#allocation3 + $0x90] sm:$0xf] }
  0x57   : > { %1073 = vmatpush.bf16.msra.mxu1 %v2009_v11  ;;  %2094 = vmatpush.bf16.msra.mxu3 %v2009_v11  ;;  %v2024_v3 = vld [vmem:[%s2579_s25 + $0xc8] sm:$0xff]  ;;  %v1978_v21 = vld [vmem:[#allocation3 + $0xa4] sm:$0xf0]  ;;  %v1975_v22 = vld [vmem:[#allocation3 + $0x94] sm:$0xf] }
  0x58   : > { %v1972_v7 = vld [vmem:[#allocation3 + $0x74] sm:$0xf0]  ;;  %v1646_v11 = vld [vmem:[#allocation3 + $0x78] sm:$0xf0]  ;;  %v1604_v23 = vld [vmem:[#allocation3 + $0x8] sm:$0xf] }
  0x59   : > { %v1996_v9 = vld [vmem:[#allocation3 + $0x134] sm:$0xf0]  ;;  %v1645_v16 = vor.u32 %v1972_v7, %v1644_v4  ;;  %v1649_v18 = vor.u32 %v1969_v10, %v1646_v11  ;;  %v1652_v44 = vld [vmem:[#allocation3 + $0x68] sm:$0xf]  ;;  %v1973_v45 = vld [vmem:[#allocation3 + $0x7c] sm:$0xf0] }
  0x5a   : > { %1030 = vmatpush.bf16.msra.mxu0 %v2000_v12  ;;  %2087 = vmatpush.bf16.msra.mxu2 %v2000_v12  ;;  %v1993_v12 = vld [vmem:[#allocation3 + $0x124] sm:$0xf]  ;;  %v1741_v17 = vor.u32 %v1996_v9, %v1740_v8  ;;  %v1970_v46 = vld [vmem:[#allocation3 + $0x6c] sm:$0xf]  ;;  %v1636_v47 = vld [vmem:[#allocation3 + $0x40] sm:$0xf] }
  0x5b   : > { %1074 = vmatpush.bf16.msra.mxu1 %v2008_v13  ;;  %2095 = vmatpush.bf16.msra.mxu3 %v2008_v13  ;;  %v1742_v13 = vld [vmem:[#allocation3 + $0x138] sm:$0xf0]  ;;  %v1968_v48 = vld [vmem:[#allocation3 + $0x54] sm:$0xf0]  ;;  %v1654_v49 = vld [vmem:[#allocation3 + $0x80] sm:$0xf0] }
  0x5c   : > { %v1745_v19 = vor.u32 %v1993_v12, %v1742_v13  ;;  %v1700_v4 = vld [vmem:[#allocation3 + $0xc8] sm:$0xf]  ;;  %v1684_v7 = vld [vmem:[#allocation3 + $0xa0] sm:$0xf]  ;;  %v1980_v8 = vld [vmem:[#allocation3 + $0xb4] sm:$0xf0] }
  0x5d   : > { %v1702_v9 = vld [vmem:[#allocation3 + $0xe0] sm:$0xf0]  ;;  %v1686_v11 = vld [vmem:[#allocation3 + $0xb8] sm:$0xf0]  ;;  %v1685_v13 = vor.u32 %v1980_v8, %v1684_v7 }
  0x5e   : > { %1031 = vmatpush.bf16.msra.mxu0 %v1999_v14  ;;  %2088 = vmatpush.bf16.msra.mxu2 %v1999_v14  ;;  %v2015_v14 = vld [vmem:[%s2579_s25 + $0x80] sm:$0xff]  ;;  %v1977_v10 = vld [vmem:[#allocation3 + $0xa4] sm:$0xf] }
  0x5f   : > { %1075 = vmatpush.bf16.msra.mxu1 %v2007_v15  ;;  %2096 = vmatpush.bf16.msra.mxu3 %v2007_v15  ;;  %v2023_v15 = vld [vmem:[%s2579_s25 + $0xc0] sm:$0xff] }
  0x61   : > { %1032 = vmatmul.bf16.vlgmr.msra.gmra.mxu0 %v1597_v26  ;;  %1052 = vmatmul.bf16.vlgmr.msra.gmra.mxu2 %v1693_v27  ;;  %v1958_v26 = vld [vmem:[#allocation3 + $0xc] sm:$0xf]  ;;  %v1606_v27 = vld [vmem:[#allocation3 + $0x20] sm:$0xf0] }
  0x62   : > { %1200 = vmatpush.bf16.msrb.mxu0 %v2038_v24  ;;  %1076 = vmatmul.bf16.vlgmr.msra.gmra.mxu1 %v1601_v28  ;;  %v1961_v24 = vld [vmem:[#allocation3 + $0x1c] sm:$0xf0]  ;;  %v1669_v28 = vor.u32 %v1978_v21, %v1668_v20  ;;  %v1986_v20 = vld [vmem:[#allocation3 + $0xe4] sm:$0xf0]  ;;  %v1726_v21 = vld [vmem:[#allocation3 + $0x110] sm:$0xf0] }
  0x63   : > { %1244 = vmatpush.bf16.msrb.mxu1 %v2046_v25  ;;  %1096 = vmatmul.bf16.vlgmr.msra.gmra.mxu3 %v1697_v29  ;;  %v1670_v25 = vld [vmem:[#allocation3 + $0xa8] sm:$0xf0]  ;;  %v1605_v29 = vor.u32 %v1961_v24, %v1604_v23 }
  0x64   : > { %1112 = vmatpush.bf16.msrb.mxu2 %v2022_v30  ;;  %1156 = vmatpush.bf16.msrb.mxu3 %v2030_v31  ;;  %v1673_v30 = vor.u32 %v1975_v22, %v1670_v25  ;;  %v1609_v31 = vor.u32 %v1958_v26, %v1606_v27  ;;  %v1983_v22 = vld [vmem:[#allocation3 + $0xd4] sm:$0xf]  ;;  %v1710_v23 = vld [vmem:[#allocation3 + $0xe8] sm:$0xf0] }
  0x66   : > { %1201 = vmatpush.bf16.msrb.mxu0 %v2037_v32  ;;  %v1628_v32 = vld [vmem:[#allocation3 + $0x38] sm:$0xf] }
  0x67   : > { %1245 = vmatpush.bf16.msrb.mxu1 %v2045_v33  ;;  %v1967_v33 = vld [vmem:[#allocation3 + $0x4c] sm:$0xf0] }
  0x68   : > { %1113 = vmatpush.bf16.msrb.mxu2 %v2021_v34  ;;  %1157 = vmatpush.bf16.msrb.mxu3 %v2029_v35  ;;  %v1964_v34 = vld [vmem:[#allocation3 + $0x3c] sm:$0xf]  ;;  %v1612_v35 = vld [vmem:[#allocation3 + $0x10] sm:$0xf]  ;;  %v1629_v40 = vor.u32 %v1967_v33, %v1628_v32 }
  0x6a   : > { %1202 = vmatpush.bf16.msrb.mxu0 %v2036_v36  ;;  %v1962_v36 = vld [vmem:[#allocation3 + $0x24] sm:$0xf0] }
  0x6b   : > { %1246 = vmatpush.bf16.msrb.mxu1 %v2044_v37  ;;  %v1630_v37 = vld [vmem:[#allocation3 + $0x50] sm:$0xf0] }
  0x6c   : > { %1114 = vmatpush.bf16.msrb.mxu2 %v2020_v38  ;;  %1158 = vmatpush.bf16.msrb.mxu3 %v2028_v39  ;;  %v1959_v38 = vld [vmem:[#allocation3 + $0x14] sm:$0xf]  ;;  %v1614_v39 = vld [vmem:[#allocation3 + $0x28] sm:$0xf0] }
  0x6d   : > { %v1617_v43 = vor.u32 %v1959_v38, %v1614_v39  ;;  %v1732_v38 = vld [vmem:[#allocation3 + $0x100] sm:$0xf]  ;;  %v1992_v39 = vld [vmem:[#allocation3 + $0x114] sm:$0xf0] }
  0x6e   : > { %1203 = vmatpush.bf16.msrb.mxu0 %v2035_v41  ;;  %v1613_v41 = vor.u32 %v1962_v36, %v1612_v35  ;;  %v1748_v35 = vld [vmem:[#allocation3 + $0x128] sm:$0xf]  ;;  %v1997_v36 = vld [vmem:[#allocation3 + $0x13c] sm:$0xf0] }
  0x6f   : > { %1247 = vmatpush.bf16.msrb.mxu1 %v2043_v42  ;;  %v1633_v42 = vor.u32 %v1964_v34, %v1630_v37  ;;  %v1994_v37 = vld [vmem:[#allocation3 + $0x12c] sm:$0xf] }
  0x70   : > { %1115 = vmatpush.bf16.msrb.mxu2 %v2019_v50  ;;  %1159 = vmatpush.bf16.msrb.mxu3 %v2027_v51  ;;  %v1965_v50 = vld [vmem:[#allocation3 + $0x44] sm:$0xf]  ;;  %v1638_v51 = vld [vmem:[#allocation3 + $0x58] sm:$0xf0] }
  0x71   : > { %1037 = vmatmul.bf16.gmra.mxu0 %v1621_v54  ;;  %1057 = vmatmul.bf16.gmra.mxu2 %v1717_v55  ;;  %v1657_v54 = vor.u32 %v1970_v46, %v1654_v49  ;;  %v1641_v55 = vor.u32 %v1965_v50, %v1638_v51  ;;  %v1733_v46 = vor.u32 %v1992_v39, %v1732_v38 }
  0x72   : > { %1204 = vmatpush.bf16.msrb.mxu0 %v2034_v52  ;;  %1081 = vmatmul.bf16.gmra.mxu1 %v1625_v56  ;;  %v1653_v52 = vor.u32 %v1973_v45, %v1652_v44  ;;  %v1676_v56 = vld [vmem:[#allocation3 + $0x98] sm:$0xf]  ;;  %v1749_v45 = vor.u32 %v1997_v36, %v1748_v35 }
  0x73   : > { %1248 = vmatpush.bf16.msrb.mxu1 %v2042_v53  ;;  %1101 = vmatmul.bf16.gmra.mxu3 %v1721_v57  ;;  %v1637_v53 = vor.u32 %v1968_v48, %v1636_v47  ;;  %v1979_v57 = vld [vmem:[#allocation3 + $0xac] sm:$0xf0] }
  0x74   : > { %1116 = vmatpush.bf16.msrb.mxu2 %v2018_v58  ;;  %1160 = vmatpush.bf16.msrb.mxu3 %v2026_v59  ;;  %v1976_v58 = vld [vmem:[#allocation3 + $0x9c] sm:$0xf]  ;;  %v1660_v59 = vld [vmem:[#allocation3 + $0x70] sm:$0xf] }
  0x76   : > { %1205 = vmatpush.bf16.msrb.mxu0 %v2033_v60  ;;  %v1974_v60 = vld [vmem:[#allocation3 + $0x84] sm:$0xf0] }
  0x77   : > { %1249 = vmatpush.bf16.msrb.mxu1 %v2041_v61  ;;  %v1678_v61 = vld [vmem:[#allocation3 + $0xb0] sm:$0xf0] }
  0x78   : > { %1117 = vmatpush.bf16.msrb.mxu2 %v2017_v62  ;;  %1161 = vmatpush.bf16.msrb.mxu3 %v2025_v63  ;;  %v1971_v62 = vld [vmem:[#allocation3 + $0x74] sm:$0xf]  ;;  %v1662_v63 = vld [vmem:[#allocation3 + $0x88] sm:$0xf0] }
  0x7a   : > { %1206 = vmatpush.bf16.msrb.mxu0 %v2032_v0  ;;  %v1677_v0 = vor.u32 %v1979_v57, %v1676_v56  ;;  %v1756_v57 = vld [vmem:[#allocation3 + $0x130] sm:$0xf] }
  0x7b   : > { %1250 = vmatpush.bf16.msrb.mxu1 %v2040_v1  ;;  %v1661_v1 = vor.u32 %v1974_v60, %v1660_v59  ;;  %v1995_v59 = vld [vmem:[#allocation3 + $0x134] sm:$0xf]  ;;  %v1758_v60 = vld [vmem:[#allocation3 + $0x148] sm:$0xf0] }
  0x7c   : > { %1118 = vmatpush.bf16.msrb.mxu2 %v2016_v2  ;;  %1162 = vmatpush.bf16.msrb.mxu3 %v2024_v3  ;;  %v1681_v2 = vor.u32 %v1976_v58, %v1678_v61  ;;  %v1665_v3 = vor.u32 %v1971_v62, %v1662_v63  ;;  %v1998_v58 = vld [vmem:[#allocation3 + $0x144] sm:$0xf0] }
  0x7d   : > { %v1757_v63 = vor.u32 %v1998_v58, %v1756_v57  ;;  %v2075_v58 = vld [vmem:[%s2588_s27 + $0x8] sm:$0xff]  }
  0x7e   : > { %1207 = vmatpush.bf16.msrb.mxu0 %v2031_v5  ;;  %v1985_v5 = vld [vmem:[#allocation3 + $0xdc] sm:$0xf0] }
  0x7f   : > { %1251 = vmatpush.bf16.msrb.mxu1 %v2039_v6  ;;  %v1982_v6 = vld [vmem:[#allocation3 + $0xcc] sm:$0xf]  ;;  %v1701_v12 = vor.u32 %v1985_v5, %v1700_v4 }
  0x80   : > { %1119 = vmatpush.bf16.msrb.mxu2 %v2015_v14  ;;  %1163 = vmatpush.bf16.msrb.mxu3 %v2023_v15  ;;  %v1705_v14 = vor.u32 %v1982_v6, %v1702_v9  ;;  %v1689_v15 = vor.u32 %v1977_v10, %v1686_v11 }
  0x81   : > { %1042 = vmatmul.bf16.gmra.mxu0 %v1645_v16  ;;  %1062 = vmatmul.bf16.gmra.mxu2 %v1741_v17  ;;  %v1724_v16 = vld [vmem:[#allocation3 + $0xf8] sm:$0xf]  ;;  %v1991_v17 = vld [vmem:[#allocation3 + $0x10c] sm:$0xf0] }
  0x82   : > { %1086 = vmatmul.bf16.gmra.mxu1 %v1649_v18  ;;  %v1988_v18 = vld [vmem:[#allocation3 + $0xfc] sm:$0xf]  ;;  %v1725_v24 = vor.u32 %v1991_v17, %v1724_v16 }
  0x83   : > { %1106 = vmatmul.bf16.gmra.mxu3 %v1745_v19  ;;  %v1708_v19 = vld [vmem:[#allocation3 + $0xd0] sm:$0xf]  ;;  %v1729_v27 = vor.u32 %v1988_v18, %v1726_v21 }
  0x84   : > { %v1709_v25 = vor.u32 %v1986_v20, %v1708_v19 }
  0x91   : > { %1047 = vmatmul.bf16.gmra.mxu0 %v1669_v28  ;;  %1120 = vmatmul.bf16.vlgmr.msrb.gmra.mxu2 %v1605_v29  ;;  %v1713_v28 = vor.u32 %v1983_v22, %v1710_v23 }
  0x92   : > { %1091 = vmatmul.bf16.gmra.mxu1 %v1673_v30 }
  0x93   : > { %1164 = vmatmul.bf16.vlgmr.msrb.gmra.mxu3 %v1609_v31 }
  0xa1   : > { %1125 = vmatmul.bf16.gmra.mxu2 %v1629_v40  ;;  %1208 = vmatmul.bf16.vlgmr.msrb.gmra.mxu0 %v1613_v41  ;;  %v1750_v40 = vld [vmem:[#allocation3 + $0x140] sm:$0xf0] }
  0xa2   : > { %1252 = vmatmul.bf16.vlgmr.msrb.gmra.mxu1 %v1617_v43  ;;  %v1989_v41 = vld [vmem:[#allocation3 + $0x104] sm:$0xf]  ;;  %v1753_v49 = vor.u32 %v1994_v37, %v1750_v40 }
  0xa3   : > { %1169 = vmatmul.bf16.gmra.mxu3 %v1633_v42  ;;  %v1734_v42 = vld [vmem:[#allocation3 + $0x118] sm:$0xf0] }
  0xa4   : > { %v1737_v50 = vor.u32 %v1989_v41, %v1734_v42 }
  0xb1   : > { %1130 = vmatmul.bf16.gmra.mxu2 %v1653_v52  ;;  %1213 = vmatmul.bf16.gmra.mxu0 %v1637_v53 }
  0xb2   : > { %1257 = vmatmul.bf16.gmra.mxu1 %v1641_v55 }
  0xb3   : > { %1174 = vmatmul.bf16.gmra.mxu3 %v1657_v54 }
  0xc1   : > { %1135 = vmatmul.bf16.gmra.mxu2 %v1677_v0  ;;  %1218 = vmatmul.bf16.gmra.mxu0 %v1661_v1 }
  0xc2   : > { %1262 = vmatmul.bf16.gmra.mxu1 %v1665_v3 }
  0xc3   : > { %1179 = vmatmul.bf16.gmra.mxu3 %v1681_v2  ;;  %v1761_v2 = vor.u32 %v1995_v59, %v1758_v60 }
  0xd1   : > { %1140 = vmatmul.bf16.gmra.mxu2 %v1701_v12  ;;  %1223 = vmatmul.bf16.gmra.mxu0 %v1685_v13 }
  0xd2   : > { %1267 = vmatmul.bf16.gmra.mxu1 %v1689_v15 }
  0xd3   : > { %1184 = vmatmul.bf16.gmra.mxu3 %v1705_v14 }
  0xde   : > { %v2642_v26 = vpop.f32.mrf.mxu0 }
  0xdf   : > { %v1077_v29 = vpop.f32.mrf.mxu1 }
  0xe0   : > { %v1078_v17 = vadd.f32 %v1077_v29, %v2642_v26 }
  0xe1   : > { %1145 = vmatmul.bf16.gmra.mxu2 %v1725_v24  ;;  %1228 = vmatmul.bf16.gmra.mxu0 %v1709_v25  ;;  %v2048_v24 = vld [vmem:[%s2588_s27] sm:$0xff]  }
  0xe2   : > { %1272 = vmatmul.bf16.gmra.mxu1 %v1713_v28  ;;  %v2049_v36 = vunpack.c.l.bf16 %v2048_v24 }
  0xe3   : > { %1189 = vmatmul.bf16.gmra.mxu3 %v1729_v27 }
  0xe4   : > { %v1053_v30 = vpop.f32.mrf.mxu2 }
  0xe6   : > { %v1097_v31 = vpop.f32.mrf.mxu3  ;;  %v1035_v33 = vpop.f32.mrf.mxu0 }
  0xe7   : > { %v2644_v32 = vadd.f32 %v1097_v31, %v1053_v30  ;;  %v1079_v34 = vpop.f32.mrf.mxu1  ;;  %v2680_v30 = vld [vmem:[%s306_s20] ss:$0 sm:$0xff] }
  0xe8   : > { %v1080_v25 = vadd.f32 %v1079_v34, %v1035_v33 }
  0xec   : > { %v1055_v43 = vpop.f32.mrf.mxu2 }
  0xee   : > { %v1099_v44 = vpop.f32.mrf.mxu3  ;;  %v1038_v48 = vpop.f32.mrf.mxu0 }
  0xef   : > { %v2646_v47 = vadd.f32 %v1099_v44, %v1055_v43  ;;  %v1082_v51 = vpop.f32.mrf.mxu1 }
  0xf0   : > { %v1083_v41 = vadd.f32 %v1082_v51, %v1038_v48 }
  0xf1   : > { %1150 = vmatmul.bf16.gmra.mxu2 %v1749_v45  ;;  %1233 = vmatmul.bf16.gmra.mxu0 %v1733_v46  ;;  %v2050_v45 = vunpack.c.h.bf16 %v2048_v24 }
  0xf2   : > { %1277 = vmatmul.bf16.gmra.mxu1 %v1737_v50 }
  0xf3   : > { %1194 = vmatmul.bf16.gmra.mxu3 %v1753_v49 }
  0xf4   : > { %v1058_v52 = vpop.f32.mrf.mxu2 }
  0xf6   : > { %v1102_v53 = vpop.f32.mrf.mxu3  ;;  %v2650_v55 = vpop.f32.mrf.mxu0 }
  0xf7   : > { %v2648_v54 = vadd.f32 %v1102_v53, %v1058_v52  ;;  %v2652_v56 = vpop.f32.mrf.mxu1 }
  0xf8   : > { %v1085_v48 = vadd.f32 %v2652_v56, %v2650_v55 }
  0xfc   : > { %v1060_v61 = vpop.f32.mrf.mxu2 }
  0xfe   : > { %v1104_v62 = vpop.f32.mrf.mxu3  ;;  %v2656_v1 = vpop.f32.mrf.mxu0 }
  0xff   : > { %v2654_v0 = vadd.f32 %v1104_v62, %v1060_v61  ;;  %v2658_v3 = vpop.f32.mrf.mxu1 }
 0x101   : > { %1238 = vmatmul.bf16.gmra.mxu0 %v1757_v63  ;;  %v2053_v63 = vunpack.c.l.bf16 %v2075_v58 }
 0x102   : > { %1282 = vmatmul.bf16.gmra.mxu1 %v1761_v2 }
 0x104   : > { %v1063_v4 = vpop.f32.mrf.mxu2 }
 0x106   : > { %v1107_v5 = vpop.f32.mrf.mxu3  ;;  %v2662_v7 = vpop.f32.mrf.mxu0 }
 0x107   : > { %v2660_v6 = vadd.f32 %v1107_v5, %v1063_v4  ;;  %v2664_v8 = vpop.f32.mrf.mxu1 }
 0x10c   : > { %v1065_v9 = vpop.f32.mrf.mxu2 }
 0x10e   : > { %v1109_v10 = vpop.f32.mrf.mxu3  ;;  %v2668_v12 = vpop.f32.mrf.mxu0 }
 0x10f   : > { %v2666_v11 = vadd.f32 %v1109_v10, %v1065_v9  ;;  %v2670_v13 = vpop.f32.mrf.mxu1 }
 0x114   : > { %v1121_v14 = vpop.f32.mrf.mxu2 }
 0x115   : > { %v1122_v19 = vadd.f32 %v1121_v14, %v1078_v17 }
 0x116   : > { %v1165_v15 = vpop.f32.mrf.mxu3  ;;  %v2672_v16 = vpop.f32.mrf.mxu0 }
 0x117   : > { %v2675_v18 = vpop.f32.mrf.mxu1  ;;  %v1166_v21 = vadd.f32 %v1165_v15, %v1122_v19  ;;  %v1088_v15 = vadd.f32 %v2658_v3, %v2656_v1 }
 0x11c   : > { %v1123_v20 = vpop.f32.mrf.mxu2 }
 0x11d   : > { %v1124_v31 = vadd.f32 %v1123_v20, %v1080_v25 }
 0x11e   : > { %v1167_v22 = vpop.f32.mrf.mxu3  ;;  %v1209_v23 = vpop.f32.mrf.mxu0 }
 0x11f   : > { %v1210_v27 = vadd.f32 %v1209_v23, %v1166_v21  ;;  %v1253_v28 = vpop.f32.mrf.mxu1  ;;  %v1168_v37 = vadd.f32 %v1167_v22, %v1124_v31  ;;  %v2054_v21 = vunpack.c.h.bf16 %v2075_v58  ;;  %v2076_v31 = vld [vmem:[%s2588_s27 + $0x10] sm:$0xff]  }
 0x121   : > { %v1254_v35 = vadd.f32 %v1253_v28, %v1210_v27 }
 0x123   : > { %v1337_v26 = vadd.f32 %v2680_v30, %v1254_v35  ;;  %v1090_v35 = vadd.f32 %v2664_v8, %v2662_v7 }
 0x124   : > { %v1126_v29 = vpop.f32.mrf.mxu2 }
 0x125   : > { %v1379_v38 = vadd.f32 %v2049_v36, %v1337_v26  ;;  %v1127_v43 = vadd.f32 %v1126_v29, %v1083_v41 }
 0x126   : > { %v1170_v39 = vpop.f32.mrf.mxu3  ;;  %v1211_v40 = vpop.f32.mrf.mxu0 }
 0x127   : > { %v1393_v42 = vmax.f32 %v1379_v38, 0.0  ;;  %v1212_v33 = vadd.f32 %v1211_v40, %v1168_v37  ;;  %v1255_v34 = vpop.f32.mrf.mxu1  ;;  %v1171_v50 = vadd.f32 %v1170_v39, %v1127_v43  ;;  %v2057_v37 = vunpack.c.l.bf16 %v2076_v31 }
 0x129   : > { %1407 = vst [vmem:[%s2684_s10] sm:$0xff] %v1393_v42  ;;  %v1256_v44 = vadd.f32 %v1255_v34, %v1212_v33  ;;  %v1093_v34 = vadd.f32 %v2670_v13, %v2668_v12 }
 0x12b   : > { %v1338_v46 = vadd.f32 %v2680_v30, %v1256_v44 }
 0x12c   : > { %v1128_v49 = vpop.f32.mrf.mxu2 }
 0x12d   : > { %v1380_v52 = vadd.f32 %v2050_v45, %v1338_v46  ;;  %v1129_v61 = vadd.f32 %v1128_v49, %v1085_v48  ;;  %v2058_v46 = vunpack.c.h.bf16 %v2076_v31  ;;  %v2077_v48 = vld [vmem:[%s2588_s27 + $0x18] sm:$0xff]  }
 0x12e   : > { %v1172_v53 = vpop.f32.mrf.mxu3  ;;  %v1214_v57 = vpop.f32.mrf.mxu0 }
 0x12f   : > { %v1394_v51 = vmax.f32 %v1380_v52, 0.0  ;;  %v1215_v59 = vadd.f32 %v1214_v57, %v1171_v50  ;;  %v1258_v60 = vpop.f32.mrf.mxu1  ;;  %v1173_v5 = vadd.f32 %v1172_v53, %v1129_v61 }
 0x131   : > { %1408 = vst [vmem:[%s2684_s10 + $0x8] sm:$0xff] %v1394_v51  ;;  %v1259_v62 = vadd.f32 %v1258_v60, %v1215_v59  ;;  %v1095_v51 = vadd.f32 %v2675_v18, %v2672_v16 }
 0x133   : > { %v1339_v2 = vadd.f32 %v2680_v30, %v1259_v62  ;;  %v2061_v62 = vunpack.c.l.bf16 %v2077_v48 }
 0x134   : > { %v1131_v4 = vpop.f32.mrf.mxu2 }
 0x135   : > { %v1381_v9 = vadd.f32 %v2053_v63, %v1339_v2  ;;  %v1132_v19 = vadd.f32 %v1131_v4, %v1088_v15 }
 0x136   : > { %v1175_v10 = vpop.f32.mrf.mxu3  ;;  %v1216_v14 = vpop.f32.mrf.mxu0 }
 0x137   : > { %v1395_v55 = vmax.f32 %v1381_v9, 0.0  ;;  %v1217_v56 = vadd.f32 %v1216_v14, %v1173_v5  ;;  %v1260_v17 = vpop.f32.mrf.mxu1  ;;  %v1176_v24 = vadd.f32 %v1175_v10, %v1132_v19 }
 0x139   : > { %1409 = vst [vmem:[%s2684_s10 + $0x10] sm:$0xff] %v1395_v55  ;;  %v1261_v20 = vadd.f32 %v1260_v17, %v1217_v56  ;;  %v2062_v56 = vunpack.c.h.bf16 %v2077_v48 }
 0x13b   : > { %v1340_v22 = vadd.f32 %v2680_v30, %v1261_v20 }
 0x13c   : > { %v1133_v23 = vpop.f32.mrf.mxu2 }
 0x13d   : > { %v1382_v25 = vadd.f32 %v2054_v21, %v1340_v22  ;;  %v1134_v26 = vadd.f32 %v1133_v23, %v1090_v35 }
 0x13e   : > { %v1177_v27 = vpop.f32.mrf.mxu3  ;;  %v1219_v28 = vpop.f32.mrf.mxu0 }
 0x13f   : > { %v1396_v1 = vmax.f32 %v1382_v25, 0.0  ;;  %v1220_v3 = vadd.f32 %v1219_v28, %v1176_v24  ;;  %v1263_v36 = vpop.f32.mrf.mxu1  ;;  %v1178_v40 = vadd.f32 %v1177_v27, %v1134_v26  ;;  %v2078_v24 = vld [vmem:[%s2588_s27 + $0x20] sm:$0xff]  }
 0x141   : > { %1410 = vst [vmem:[%s2684_s10 + $0x18] sm:$0xff] %v1396_v1  ;;  %v1264_v29 = vadd.f32 %v1263_v36, %v1220_v3  ;;  %v2065_v1 = vunpack.c.l.bf16 %v2078_v24 }
 0x143   : > { %v1341_v38 = vadd.f32 %v2680_v30, %v1264_v29 }
 0x144   : > { %v1136_v39 = vpop.f32.mrf.mxu2 }
 0x145   : > { %v1383_v41 = vadd.f32 %v2057_v37, %v1341_v38  ;;  %v1137_v44 = vadd.f32 %v1136_v39, %v1093_v34 }
 0x146   : > { %v1180_v42 = vpop.f32.mrf.mxu3  ;;  %v1221_v33 = vpop.f32.mrf.mxu0 }
 0x147   : > { %v1397_v7 = vmax.f32 %v1383_v41, 0.0  ;;  %v1222_v8 = vadd.f32 %v1221_v33, %v1178_v40  ;;  %v1265_v43 = vpop.f32.mrf.mxu1  ;;  %v1181_v52 = vadd.f32 %v1180_v42, %v1137_v44  ;;  %v2066_v33 = vunpack.c.h.bf16 %v2078_v24  ;;  %v2079_v44 = vld [vmem:[%s2588_s27 + $0x28] sm:$0xff]  }
 0x149   : > { %1411 = vst [vmem:[%s2684_s10 + $0x20] sm:$0xff] %v1397_v7  ;;  %v1266_v45 = vadd.f32 %v1265_v43, %v1222_v8 }
 0x14b   : > { %v1342_v49 = vadd.f32 %v2680_v30, %v1266_v45 }
 0x14c   : > { %v1138_v50 = vpop.f32.mrf.mxu2 }
 0x14d   : > { %v1384_v53 = vadd.f32 %v2058_v46, %v1342_v49  ;;  %v1139_v60 = vadd.f32 %v1138_v50, %v1095_v51 }
 0x14e   : > { %v1182_v57 = vpop.f32.mrf.mxu3  ;;  %v1224_v58 = vpop.f32.mrf.mxu0 }
 0x14f   : > { %v1398_v12 = vmax.f32 %v1384_v53, 0.0  ;;  %v1225_v13 = vadd.f32 %v1224_v58, %v1181_v52  ;;  %v1268_v59 = vpop.f32.mrf.mxu1  ;;  %v1183_v4 = vadd.f32 %v1182_v57, %v1139_v60  ;;  %v2069_v57 = vunpack.c.l.bf16 %v2079_v44 }
 0x151   : > { %1412 = vst [vmem:[%s2684_s10 + $0x28] sm:$0xff] %v1398_v12  ;;  %v1269_v61 = vadd.f32 %v1268_v59, %v1225_v13 }
 0x153   : > { %v1343_v63 = vadd.f32 %v2680_v30, %v1269_v61 }
 0x154   : > { %v1141_v2 = vpop.f32.mrf.mxu2 }
 0x155   : > { %v1385_v5 = vadd.f32 %v2061_v62, %v1343_v63  ;;  %v1142_v18 = vadd.f32 %v1141_v2, %v2644_v32  ;;  %v2070_v63 = vunpack.c.h.bf16 %v2079_v44 }
 0x156   : > { %v1185_v9 = vpop.f32.mrf.mxu3  ;;  %v1226_v10 = vpop.f32.mrf.mxu0 }
 0x157   : > { %v1399_v14 = vmax.f32 %v1385_v5, 0.0  ;;  %v1227_v15 = vadd.f32 %v1226_v10, %v1183_v4  ;;  %v1270_v16 = vpop.f32.mrf.mxu1  ;;  %v1186_v20 = vadd.f32 %v1185_v9, %v1142_v18 }
 0x159   : > { %1413 = vst [vmem:[%s2684_s10 + $0x30] sm:$0xff] %v1399_v14  ;;  %v1271_v55 = vadd.f32 %v1270_v16, %v1227_v15  ;;  %v2080_v14 = vld [vmem:[%s2588_s27 + $0x30] sm:$0xff]  }
 0x15b   : > { %v1344_v17 = vadd.f32 %v2680_v30, %v1271_v55 }
 0x15c   : > { %v1143_v19 = vpop.f32.mrf.mxu2 }
 0x15d   : > { %v1386_v21 = vadd.f32 %v2062_v56, %v1344_v17  ;;  %v1144_v31 = vadd.f32 %v1143_v19, %v2646_v47  ;;  %v2073_v56 = vunpack.c.l.bf16 %v2080_v14 }
 0x15e   : > { %v1187_v22 = vpop.f32.mrf.mxu3  ;;  %v1229_v23 = vpop.f32.mrf.mxu0 }
 0x15f   : > { %v1400_v25 = vmax.f32 %v1386_v21, 0.0  ;;  %v1230_v27 = vadd.f32 %v1229_v23, %v1186_v20  ;;  %v1273_v28 = vpop.f32.mrf.mxu1  ;;  %v1188_v36 = vadd.f32 %v1187_v22, %v1144_v31 }
 0x161   : > { %1414 = vst [vmem:[%s2684_s10 + $0x38] sm:$0xff] %v1400_v25  ;;  %v1274_v35 = vadd.f32 %v1273_v28, %v1230_v27  ;;  %v2074_v27 = vunpack.c.h.bf16 %v2080_v14 }
 0x163   : > { %v1345_v32 = vadd.f32 %v2680_v30, %v1274_v35 }
 0x164   : > { %v1146_v3 = vpop.f32.mrf.mxu2 }
 0x165   : > { %v1387_v26 = vadd.f32 %v2065_v1, %v1345_v32  ;;  %v1147_v41 = vadd.f32 %v1146_v3, %v2648_v54 }
 0x166   : > { %v1190_v29 = vpop.f32.mrf.mxu3  ;;  %v1231_v37 = vpop.f32.mrf.mxu0 }
 0x167   : > { %v1401_v38 = vmax.f32 %v1387_v26, 0.0  ;;  %v1232_v39 = vadd.f32 %v1231_v37, %v1188_v36  ;;  %v1275_v40 = vpop.f32.mrf.mxu1  ;;  %v1191_v7 = vadd.f32 %v1190_v29, %v1147_v41 }
 0x169   : > { %1415 = vst [vmem:[%s2684_s10 + $0x40] sm:$0xff] %v1401_v38  ;;  %v1276_v42 = vadd.f32 %v1275_v40, %v1232_v39 }
 0x16b   : > { %v1346_v47 = vadd.f32 %v2680_v30, %v1276_v42 }
 0x16c   : > { %v1148_v34 = vpop.f32.mrf.mxu2 }
 0x16d   : > { %v1388_v8 = vadd.f32 %v2066_v33, %v1346_v47  ;;  %v1149_v52 = vadd.f32 %v1148_v34, %v2654_v0 }
 0x16e   : > { %v1234_v43 = vpop.f32.mrf.mxu0  ;;  %v1192_v50 = vpop.f32.mrf.mxu3 }
 0x16f   : > { %v1402_v45 = vmax.f32 %v1388_v8, 0.0  ;;  %v1235_v46 = vadd.f32 %v1234_v43, %v1191_v7  ;;  %v1278_v49 = vpop.f32.mrf.mxu1  ;;  %v1193_v48 = vadd.f32 %v1192_v50, %v1149_v52 }
 0x171   : > { %1416 = vst [vmem:[%s2684_s10 + $0x48] sm:$0xff] %v1402_v45  ;;  %v1279_v53 = vadd.f32 %v1278_v49, %v1235_v46 }
 0x173   : > { %v1347_v54 = vadd.f32 %v2680_v30, %v1279_v53 }
 0x174   : > { %v1151_v58 = vpop.f32.mrf.mxu2 }
 0x175   : > { %v1389_v51 = vadd.f32 %v2069_v57, %v1347_v54  ;;  %v1152_v61 = vadd.f32 %v1151_v58, %v2660_v6 }
 0x176   : > { %v1236_v12 = vpop.f32.mrf.mxu0  ;;  %v1195_v2 = vpop.f32.mrf.mxu3 }
 0x177   : > { %v1403_v13 = vmax.f32 %v1389_v51, 0.0  ;;  %v1237_v59 = vadd.f32 %v1236_v12, %v1193_v48  ;;  %v1280_v60 = vpop.f32.mrf.mxu1  ;;  %v1196_v4 = vadd.f32 %v1195_v2, %v1152_v61 }
 0x179   : > { %1417 = vst [vmem:[%s2684_s10 + $0x50] sm:$0xff] %v1403_v13  ;;  %v1281_v62 = vadd.f32 %v1280_v60, %v1237_v59 }
 0x17b   : > { %v1348_v0 = vadd.f32 %v2680_v30, %v1281_v62 }
 0x17c   : > { %v1153_v9 = vpop.f32.mrf.mxu2 }
 0x17d   : > { %v1390_v5 = vadd.f32 %v2070_v63, %v1348_v0  ;;  %v1154_v55 = vadd.f32 %v1153_v9, %v2666_v11 }
 0x17e   : > { %v1239_v10 = vpop.f32.mrf.mxu0  ;;  %v1197_v19 = vpop.f32.mrf.mxu3 }
 0x17f   : > { %v1404_v15 = vmax.f32 %v1390_v5, 0.0  ;;  %v1240_v16 = vadd.f32 %v1239_v10, %v1196_v4  ;;  %v1283_v18 = vpop.f32.mrf.mxu1  ;;  %v1198_v20 = vadd.f32 %v1197_v19, %v1154_v55 }
 0x181   : > { %1418 = vst [vmem:[%s2684_s10 + $0x58] sm:$0xff] %v1404_v15  ;;  %v1284_v6 = vadd.f32 %v1283_v18, %v1240_v16 }
 0x183   : > { %v1349_v17 = vadd.f32 %v2680_v30, %v1284_v6 }
 0x185   : > { %v1391_v21 = vadd.f32 %v2073_v56, %v1349_v17 }
 0x186   : > { %v1241_v22 = vpop.f32.mrf.mxu0 }
 0x187   : > { %v1405_v23 = vmax.f32 %v1391_v21, 0.0  ;;  %v1242_v24 = vadd.f32 %v1241_v22, %v1198_v20  ;;  %v1285_v25 = vpop.f32.mrf.mxu1 }
 0x189   : > { %1419 = vst [vmem:[%s2684_s10 + $0x60] sm:$0xff] %v1405_v23  ;;  %v1286_v11 = vadd.f32 %v1285_v25, %v1242_v24 }
 0x18b   : > { %v1350_v28 = vadd.f32 %v2680_v30, %v1286_v11 }
 0x18d   : > { %v1392_v31 = vadd.f32 %v2074_v27, %v1350_v28 }
 0x18f   : > { %v1406_v35 = vmax.f32 %v1392_v31, 0.0 }
 0x191   : > { %1420 = vst [vmem:[%s2684_s10 + $0x68] sm:$0xff] %v1406_v35 }
 0x192   : > { %2341 = shalt.err (!%p2338_p13)
}
 0x193   : > { %s2412_s0 = smov 128   ;;  %s2413_s1 = smov 256  }
 0x194   : > { %s2414_s17 = smov 8  }
 0x195   : > { %2112 = dma.vmem_to_hbm [thread:$0]  (%p2528_p0), %s1437_s28, 1792, %s1439_s5, %s1422_s18, %s2412_s0, %s2413_s1, %s2414_s17  }
 0x196 PF: > { %s2809_s25 = sld [smem:[#allocation17_spill]]  ;;  %s1453_s2 = sand.u32 1, %s2384_s15  }
 0x197   : > { %p2129_p4 = pnand %p1589_p3, %p2532_p2  ;;  %s1454_s20 = scalar_lea.sflag [#allocation5], %s1453_s2 }
 0x199   : > { %p2130_p5 = pneg %p2129_p4 }
 0x19b   : > { %2379 = dma.done.wait (%p2130_p5), %s1454_s20, 1792  }
 0x19c   : > { %2381 = vsyncadd (%p2130_p5), %s1454_s20, 4294965504  ;;  %s24_s20 = sadd.s32 1, %s2809_s25   ;;  %s2810_s26 = sld [smem:[#allocation16_spill]] }
 0x19d   : > { %p21_p1 = scmp.ge.s32.totalorder %s24_s20, 4   ;;  %s2811_s17 = sld [smem:[#allocation19_spill]] }
 0x19e   : > { %s2812_s24 = sld [smem:[#allocation18_spill]]  ;;  %s2813_s15 = smov %s2388_s16 }
 0x19f   : > { %s2815_s18 = smov %s2400_s19 }
 0x1a0   :  { %23 = sbr.rel (!%p21_p1) target bundleno = 13 (0xd), region = 119 }
 0x1a2   : > { %s2814_s16 = smov %s2810_s26 }
 0x1a4   : > { %s2816_s19 = smov %s2812_s24 }
 0x1a5   :  { %1460 = vsyncpa [#allocation4], 1 }
 0x1a6   :  { %1462 = vsyncpa [#allocation4 + $0x1], 1 }
 0x1a7   :  { %1463 = vsyncpa [#allocation7], 1 }
 0x1a8   :  { %1465 = vsyncpa [#allocation7 + $0x1], 1 }
 0x1a9   :  { %1466 = vsyncpa [#allocation10], 1 }
 0x1aa   :  { %1468 = vsyncpa [#allocation10 + $0x1], 1 }
 0x1ab   :  { %1469 = vsyncpa [#allocation5], 1 }
 0x1ac   :  { %1471 = vsyncpa [#allocation5 + $0x1], 1 }

</bundles_post_ra>
